<compile_context>
chip_gen: v7x
topology: tpu7x:2x2x1
jax: 0.10.0
libtpu: 0.0.40
codegen_flags: <defaults>
</compile_context>

<pallas_src>
import functools

import jax
import jax.numpy as jnp
from jax import lax
from jax.experimental import pallas as pl
from jax.experimental.pallas import tpu as pltpu


def _byol_partial_kernel(x_ref, t_ref, o_ref, *, rows_total, tile_n, group,
                         fold_lanes, mask_tail):
    """Accumulate sum_i x_i * t_i over this block's rows into an (8, d_out) partial."""
    d = x_ref.shape[1]
    pid = pl.program_id(0)
    # Number of in-bounds rows in this block (>= tile_n for all but the last).
    valid = rows_total - pid * tile_n

    n_groups = tile_n // group

    def body(g, acc):
        start = pl.multiple_of(g * group, group)
        xg = x_ref[pl.ds(start, group), :].astype(jnp.float32)
        tg = t_ref[pl.ds(start, group), :].astype(jnp.float32)
        prod = xg * tg
        if mask_tail:
            # Zero out rows past the true row count (OOB block rows = garbage).
            row_ids = start + lax.broadcasted_iota(jnp.int32, (group, 1), 0)
            prod = jnp.where(row_ids < valid, prod, 0.0)
        # Fold row-groups of 8 (sublane-aligned): pure VPU vreg+vreg adds.
        return acc + prod.reshape(group // 8, 8, d).sum(axis=0)

    acc = lax.fori_loop(0, n_groups, body,
                        jnp.zeros((8, d), jnp.float32), unroll=4)
    if fold_lanes:
        # Fold 128-lane tiles together (still vreg+vreg adds, no XLU reduce).
        acc = acc.reshape(8, d // 128, 128).sum(axis=1)
    o_ref[0] = acc


def _round_up(a, b):
    return ((a + b - 1) // b) * b


def byol_loss(x, t, *, target_block_bytes=4 * 1024 * 1024):
    """2 - 2 * mean_over_rows(<x_i, t_i>); rows = all leading dims, feature = last dim."""
    assert x.shape == t.shape, (x.shape, t.shape)
    d = x.shape[-1]
    x2 = x.reshape(-1, d)
    t2 = t.reshape(-1, d)
    n = x2.shape[0]

    itemsize = jnp.dtype(x2.dtype).itemsize
    bytes_per_row = d * itemsize

    # Rows per in-kernel reduction step: multiple of 8, shrunk if d is huge.
    group = 64
    while group > 8 and group * bytes_per_row > target_block_bytes:
        group //= 2
    group = max(group, 8)

    # Row tile: ~target_block_bytes per input block (in the input dtype),
    # a multiple of `group`, and never (much) larger than the row count.
    tile_n = max(group, (target_block_bytes // bytes_per_row) // group * group)
    tile_n = min(tile_n, _round_up(n, group))

    num_blocks = pl.cdiv(n, tile_n)
    rem = n % tile_n                      # static at trace time
    fold_lanes = (d % 128 == 0)
    d_out = 128 if fold_lanes else d

    kernel = functools.partial(
        _byol_partial_kernel,
        rows_total=n,
        tile_n=tile_n,
        group=group,
        fold_lanes=fold_lanes,
        mask_tail=(rem != 0),
    )

    partials = pl.pallas_call(
        kernel,
        out_shape=jax.ShapeDtypeStruct((num_blocks, 8, d_out), jnp.float32),
        grid_spec=pltpu.PrefetchScalarGridSpec(
            num_scalar_prefetch=0,
            grid=(num_blocks,),
            in_specs=[
                pl.BlockSpec((tile_n, d), lambda i: (i, 0)),
                pl.BlockSpec((tile_n, d), lambda i: (i, 0)),
            ],
            out_specs=pl.BlockSpec((1, 8, d_out), lambda i: (i, 0, 0)),
        ),
        compiler_params=pltpu.CompilerParams(
            # Each block writes its own output tile -> safe to shard the row
            # sweep across TensorCores (v7x megacore).
            dimension_semantics=("parallel",),
            # 2 inputs x 2 buffers x ~4 MiB blocks + small loop temporaries:
            # fits under v7x's 64 MiB physical VMEM, overrides v5e's 16 MiB
            # scoped default.
            vmem_limit_bytes=48 * 1024 * 1024,
        ),
    )(x2, t2)

    # Tiny epilogue in plain JAX: reduce the per-block (8, d_out) partials,
    # then the BYOL affine.  Divide by the *true* row count.
    total = jnp.sum(partials, dtype=jnp.float32)
    return 2.0 - 2.0 * total / jnp.float32(n)


def byol_loss_ref(x, t):
    xf = x.astype(jnp.float32)
    tf = t.astype(jnp.float32)
    loss = 2.0 - 2.0 * jnp.sum(xf * tf, axis=-1)
    return jnp.mean(loss)


if __name__ == "__main__":
    key = jax.random.PRNGKey(0)
    k1, k2, k3, k4, k5, k6 = jax.random.split(key, 6)

    def _normed(k, shape, dtype=jnp.float32):
        v = jax.random.normal(k, shape, dtype=jnp.float32)
        v = v / jnp.linalg.norm(v, axis=-1, keepdims=True)
        return v.astype(dtype)

    # Case 1: aligned shapes (typical BYOL projector output, L2-normalized).
    x1 = _normed(k1, (256, 128))
    t1 = _normed(k2, (256, 128))
    out1 = jax.block_until_ready(byol_loss(x1, t1))
    ref1 = byol_loss_ref(x1, t1)
    assert jnp.allclose(out1, ref1, atol=1e-5, rtol=1e-5), (out1, ref1)

    # Case 2: ragged rows AND feature dim (exercise the no-pad tail-mask path).
    x2 = _normed(k3, (19, 96))
    t2 = _normed(k4, (19, 96))
    out2 = jax.block_until_ready(byol_loss(x2, t2))
    ref2 = byol_loss_ref(x2, t2)
    assert jnp.allclose(out2, ref2, atol=1e-5, rtol=1e-5), (out2, ref2)

    # Case 3: bf16 inputs (dtype-aware tile sizing) with unaligned row count.
    x3 = _normed(k5, (200, 256), dtype=jnp.bfloat16)
    t3 = _normed(k6, (200, 256), dtype=jnp.bfloat16)
    out3 = jax.block_until_ready(byol_loss(x3, t3))
    ref3 = byol_loss_ref(x3, t3)
    assert jnp.allclose(out3, ref3, atol=1e-4, rtol=1e-4), (out3, ref3)

    print("KERNEL_OK")
</pallas_src>

<mosaic_0001>
module attributes {stable_mosaic.version = 11 : i64} {
  func.func @_byol_partial_kernel(%arg0: i32, %arg1: memref<256x128xf32, #tpu.memory_space<vmem>>, %arg2: memref<256x128xf32, #tpu.memory_space<vmem>>, %arg3: memref<1x8x128xf32, #tpu.memory_space<vmem>>) attributes {dimension_semantics = [#tpu.dimension_semantics<parallel>], iteration_bounds = array<i64: 1>, scalar_prefetch = 0 : i64, scratch_operands = 0 : i64, tpu.core_type = #tpu.core_type<tc>, window_params = [{transform_indices = @transform_0, window_bounds = array<i64: 256, 128>}, {transform_indices = @transform_1, window_bounds = array<i64: 256, 128>}, {transform_indices = @transform_2, window_bounds = array<i64: 1, 8, 128>}]} {
    %cst = arith.constant 0.000000e+00 : f32
    %0 = vector.broadcast %cst : f32 to vector<8x128xf32>
    %c0_i32 = arith.constant 0 : i32
    %c64_i32 = arith.constant 64 : i32
    %1 = arith.muli %c0_i32, %c64_i32 : i32
    %2 = tpu.assume_multiple %1, 64 : i32
    %3 = arith.index_cast %2 : i32 to index
    %c0 = arith.constant 0 : index
    %4 = vector.load %arg1[%3, %c0] : memref<256x128xf32, #tpu.memory_space<vmem>>, vector<64x128xf32>
    %5 = arith.index_cast %2 : i32 to index
    %c0_0 = arith.constant 0 : index
    %6 = vector.load %arg2[%5, %c0_0] : memref<256x128xf32, #tpu.memory_space<vmem>>, vector<64x128xf32>
    %7 = arith.mulf %4, %6 : vector<64x128xf32>
    %8 = vector.shape_cast %7 : vector<64x128xf32> to vector<8x8x128xf32>
    %cst_1 = arith.constant dense<0.000000e+00> : vector<8x128xf32>
    %9 = vector.multi_reduction <add>, %8, %cst_1 [0] : vector<8x8x128xf32> to vector<8x128xf32>
    %10 = arith.addf %0, %9 : vector<8x128xf32>
    %c1_i32 = arith.constant 1 : i32
    %c64_i32_2 = arith.constant 64 : i32
    %11 = arith.muli %c1_i32, %c64_i32_2 : i32
    %12 = tpu.assume_multiple %11, 64 : i32
    %13 = arith.index_cast %12 : i32 to index
    %c0_3 = arith.constant 0 : index
    %14 = vector.load %arg1[%13, %c0_3] : memref<256x128xf32, #tpu.memory_space<vmem>>, vector<64x128xf32>
    %15 = arith.index_cast %12 : i32 to index
    %c0_4 = arith.constant 0 : index
    %16 = vector.load %arg2[%15, %c0_4] : memref<256x128xf32, #tpu.memory_space<vmem>>, vector<64x128xf32>
    %17 = arith.mulf %14, %16 : vector<64x128xf32>
    %18 = vector.shape_cast %17 : vector<64x128xf32> to vector<8x8x128xf32>
    %cst_5 = arith.constant dense<0.000000e+00> : vector<8x128xf32>
    %19 = vector.multi_reduction <add>, %18, %cst_5 [0] : vector<8x8x128xf32> to vector<8x128xf32>
    %20 = arith.addf %10, %19 : vector<8x128xf32>
    %c2_i32 = arith.constant 2 : i32
    %c64_i32_6 = arith.constant 64 : i32
    %21 = arith.muli %c2_i32, %c64_i32_6 : i32
    %22 = tpu.assume_multiple %21, 64 : i32
    %23 = arith.index_cast %22 : i32 to index
    %c0_7 = arith.constant 0 : index
    %24 = vector.load %arg1[%23, %c0_7] : memref<256x128xf32, #tpu.memory_space<vmem>>, vector<64x128xf32>
    %25 = arith.index_cast %22 : i32 to index
    %c0_8 = arith.constant 0 : index
    %26 = vector.load %arg2[%25, %c0_8] : memref<256x128xf32, #tpu.memory_space<vmem>>, vector<64x128xf32>
    %27 = arith.mulf %24, %26 : vector<64x128xf32>
    %28 = vector.shape_cast %27 : vector<64x128xf32> to vector<8x8x128xf32>
    %cst_9 = arith.constant dense<0.000000e+00> : vector<8x128xf32>
    %29 = vector.multi_reduction <add>, %28, %cst_9 [0] : vector<8x8x128xf32> to vector<8x128xf32>
    %30 = arith.addf %20, %29 : vector<8x128xf32>
    %c3_i32 = arith.constant 3 : i32
    %c64_i32_10 = arith.constant 64 : i32
    %31 = arith.muli %c3_i32, %c64_i32_10 : i32
    %32 = tpu.assume_multiple %31, 64 : i32
    %33 = arith.index_cast %32 : i32 to index
    %c0_11 = arith.constant 0 : index
    %34 = vector.load %arg1[%33, %c0_11] : memref<256x128xf32, #tpu.memory_space<vmem>>, vector<64x128xf32>
    %35 = arith.index_cast %32 : i32 to index
    %c0_12 = arith.constant 0 : index
    %36 = vector.load %arg2[%35, %c0_12] : memref<256x128xf32, #tpu.memory_space<vmem>>, vector<64x128xf32>
    %37 = arith.mulf %34, %36 : vector<64x128xf32>
    %38 = vector.shape_cast %37 : vector<64x128xf32> to vector<8x8x128xf32>
    %cst_13 = arith.constant dense<0.000000e+00> : vector<8x128xf32>
    %39 = vector.multi_reduction <add>, %38, %cst_13 [0] : vector<8x8x128xf32> to vector<8x128xf32>
    %40 = arith.addf %30, %39 : vector<8x128xf32>
    %c4_i32 = arith.constant 4 : i32
    %41 = vector.shape_cast %40 : vector<8x128xf32> to vector<8x1x128xf32>
    %cst_14 = arith.constant dense<0.000000e+00> : vector<8x128xf32>
    %42 = vector.multi_reduction <add>, %41, %cst_14 [1] : vector<8x1x128xf32> to vector<8x128xf32>
    %c0_15 = arith.constant 0 : index
    %c0_16 = arith.constant 0 : index
    %c0_17 = arith.constant 0 : index
    %43 = vector.load %arg3[%c0_15, %c0_16, %c0_17] : memref<1x8x128xf32, #tpu.memory_space<vmem>>, vector<1x8x128xf32>
    %44 = vector.shape_cast %43 : vector<1x8x128xf32> to vector<8x128xf32>
    %45 = vector.shape_cast %42 : vector<8x128xf32> to vector<1x8x128xf32>
    tpu.vector_store %arg3[%c0_15, %c0_16, %c0_17], %45 {strides = array<i32>} : memref<1x8x128xf32, #tpu.memory_space<vmem>>, vector<1x8x128xf32>,
    return
  }
  func.func @transform_0(%arg0: i32) -> (i32, i32) {
    %c0_i32 = arith.constant 0 : i32
    %c0_i32_0 = arith.constant 0 : i32
    return %arg0, %c0_i32 : i32, i32
  }
  func.func @transform_1(%arg0: i32) -> (i32, i32) {
    %c0_i32 = arith.constant 0 : i32
    %c0_i32_0 = arith.constant 0 : i32
    return %arg0, %c0_i32 : i32, i32
  }
  func.func @transform_2(%arg0: i32) -> (i32, i32, i32) {
    %c0_i32 = arith.constant 0 : i32
    %c0_i32_0 = arith.constant 0 : i32
    %c0_i32_1 = arith.constant 0 : i32
    return %arg0, %c0_i32, %c0_i32_0 : i32, i32, i32
  }
}

</mosaic_0001>

<bundles_post_ra>
// kernel: tpu_custom_call.1
= control target key start
LH: loop header
LB: loop body
LE: loop exit
PB: predicated region body
PF: predicated region fallthrough
CT: control target
= control target key end

     0   :  { %7 = vsyncpa [#allocation3], 0  ;;  %s325_s0 = inlined_call_operand.hbm [shape: f32[256,128], index: 0, kind: input, shape index: {}]   ;;  %s326_s1 = inlined_call_operand.hbm [shape: f32[256,128], index: 1, kind: input, shape index: {}]   ;;  %s327_s2 = inlined_call_operand.hbm [shape: f32[1,8,128], index: 2, kind: output, shape index: {}]  }
   0x1   :  { %8 = vsyncpa [#allocation6], 0 }
   0x2   :  { %9 = vsyncpa [#allocation4], 0  ;;  %s269_s9 = smov [#allocation2]   ;;  %s197_s13 = scalar_lea.hbm %s325_s0, 4096 }
   0x3   :  { %s15_s10 = sshll.u32 %s269_s9, 4  ;;  %p198_p0 = scmp.ne.s32.totalorder %s325_s0, %s197_s13  ;;  %s16_s10 = int_to_ptr.vmem [resolvable:$true] %s15_s10 }
   0x4   :  { %p201_p1 = scmp.lt.u32.totalorder %s197_s13, %s325_s0 }
   0x6   :  { %p203_p2 = pnand %p201_p1, %p198_p0 }
   0x8   :  { %206 = shalt.err (!%p203_p2)
}
   0x9   :  { %s207_s18 = scalar_lea.vmem %s16_s10, 4096  ;;  %p212_p4 = scmp.lt.s32.totalorder %s16_s10, %s16_s10 }
   0xa   :  { %p208_p3 = scmp.ne.s32.totalorder %s16_s10, %s207_s18  ;;  %p213_p5 = scmp.lt.s32.totalorder %s207_s18, %s207_s18 }
   0xc   :  { %p214_p6 = por %p213_p5, %p212_p4 }
   0xe   :  { %p215_p7 = pnand %p214_p6, %p208_p3 }
  0x10   :  { %218 = shalt.err (!%p215_p7)
}
  0x11   :  { %s270_s19 = smov 128   ;;  %s271_s20 = smov 8  }
  0x12   :  { %21 = dma.hbm_to_vmem [thread:$0]  %s325_s0, 4096, %s16_s10, [#allocation3], %s270_s19, %s270_s19, %s271_s20  }
  0x13   :  { %s272_s23 = smov [#allocation5]   ;;  %s219_s27 = scalar_lea.hbm %s326_s1, 4096 }
  0x14   :  { %s27_s24 = sshll.u32 %s272_s23, 4  ;;  %p220_p8 = scmp.ne.s32.totalorder %s326_s1, %s219_s27  ;;  %s28_s24 = int_to_ptr.vmem [resolvable:$true] %s27_s24 }
  0x15   :  { %p223_p9 = scmp.lt.u32.totalorder %s219_s27, %s326_s1 }
  0x17   :  { %p225_p10 = pnand %p223_p9, %p220_p8 }
  0x19   :  { %228 = shalt.err (!%p225_p10)
}
  0x1a   :  { %s229_s4 = scalar_lea.vmem %s28_s24, 4096  ;;  %p234_p12 = scmp.lt.s32.totalorder %s28_s24, %s28_s24 }
  0x1b   :  { %p230_p11 = scmp.ne.s32.totalorder %s28_s24, %s229_s4  ;;  %p235_p13 = scmp.lt.s32.totalorder %s229_s4, %s229_s4 }
  0x1d   :  { %p236_p0 = por %p235_p13, %p234_p12 }
  0x1f   :  { %p237_p1 = pnand %p236_p0, %p230_p11 }
  0x21   :  { %240 = shalt.err (!%p237_p1)
}
  0x22   :  { %33 = dma.hbm_to_vmem [thread:$0]  %s326_s1, 4096, %s28_s24, [#allocation6], %s270_s19, %s270_s19, %s271_s20  }
  0x23   :  { %263 = dma.done.wait [#allocation3], 4096  }
  0x24   :  { %264 = vsyncadd [#allocation3], 4294963200 }
  0x25   :  { %265 = dma.done.wait [#allocation6], 4096  }
  0x26   :  { %266 = vsyncadd [#allocation6], 4294963200  ;;  %v40_v0 = vld [vmem:[#allocation2] sm:$0xff]  ;;  %v41_v1 = vld [vmem:[#allocation2 + $0x8] sm:$0xff]  ;;  %s273_s1 = smov [#allocation7]  }
  0x27   :  { %v42_v2 = vld [vmem:[#allocation2 + $0x10] sm:$0xff]  ;;  %v43_v3 = vld [vmem:[#allocation2 + $0x18] sm:$0xff]  ;;  %v48_v4 = vld [vmem:[#allocation5] sm:$0xff]  ;;  %s182_s6 = sshll.u32 %s273_s1, 4  ;;  %s183_s6 = int_to_ptr.vmem [resolvable:$true] %s182_s6 }
  0x28   :  { %v49_v5 = vld [vmem:[#allocation5 + $0x8] sm:$0xff]  ;;  %v50_v6 = vld [vmem:[#allocation5 + $0x10] sm:$0xff]  ;;  %v51_v7 = vld [vmem:[#allocation5 + $0x18] sm:$0xff]  ;;  %v56_v8 = vmul.f32 %v48_v4, %v40_v0  ;;  %s241_s7 = scalar_lea.vmem %s183_s6, 128  ;;  %p246_p3 = scmp.lt.s32.totalorder %s183_s6, %s183_s6 }
  0x29   :  { %v57_v9 = vmul.f32 %v49_v5, %v41_v1  ;;  %v58_v10 = vmul.f32 %v50_v6, %v42_v2  ;;  %v44_v11 = vld [vmem:[#allocation2 + $0x20] sm:$0xff]  ;;  %v59_v13 = vmul.f32 %v51_v7, %v43_v3  ;;  %v74_v16 = vld [vmem:[#allocation2 + $0x48] sm:$0xff]  ;;  %v75_v17 = vld [vmem:[#allocation2 + $0x50] sm:$0xff]  ;;  %p242_p2 = scmp.ne.s32.totalorder %s183_s6, %s241_s7  ;;  %p247_p4 = scmp.lt.s32.totalorder %s241_s7, %s241_s7 }
  0x2a   :  { %v52_v12 = vld [vmem:[#allocation5 + $0x20] sm:$0xff]  ;;  %v76_v18 = vld [vmem:[#allocation2 + $0x58] sm:$0xff]  ;;  %v83_v22 = vld [vmem:[#allocation5 + $0x48] sm:$0xff] }
  0x2b   :  { %v64_v14 = vadd.f32 %v57_v9, %v56_v8  ;;  %v73_v15 = vld [vmem:[#allocation2 + $0x40] sm:$0xff]  ;;  %v60_v19 = vmul.f32 %v52_v12, %v44_v11  ;;  %v84_v23 = vld [vmem:[#allocation5 + $0x50] sm:$0xff]  ;;  %v45_v24 = vld [vmem:[#allocation2 + $0x28] sm:$0xff]  ;;  %v91_v28 = vmul.f32 %v83_v22, %v74_v16  ;;  %p248_p5 = por %p247_p4, %p246_p3 }
  0x2c   :  { %v82_v21 = vld [vmem:[#allocation5 + $0x40] sm:$0xff]  ;;  %v53_v25 = vld [vmem:[#allocation5 + $0x28] sm:$0xff]  ;;  %v85_v26 = vld [vmem:[#allocation5 + $0x58] sm:$0xff]  ;;  %v92_v29 = vmul.f32 %v84_v23, %v75_v17 }
  0x2d   :  { %v65_v20 = vadd.f32 %v64_v14, %v58_v10  ;;  %v90_v27 = vmul.f32 %v82_v21, %v73_v15  ;;  %v77_v31 = vld [vmem:[#allocation2 + $0x60] sm:$0xff]  ;;  %v46_v33 = vld [vmem:[#allocation2 + $0x30] sm:$0xff]  ;;  %v78_v35 = vld [vmem:[#allocation2 + $0x68] sm:$0xff]  ;;  %v93_v36 = vmul.f32 %v85_v26, %v76_v18  ;;  %v61_v40 = vmul.f32 %v53_v25, %v45_v24  ;;  %p249_p6 = pnand %p248_p5, %p242_p2 }
  0x2e   :  { %v86_v32 = vld [vmem:[#allocation5 + $0x60] sm:$0xff]  ;;  %v54_v34 = vld [vmem:[#allocation5 + $0x30] sm:$0xff]  ;;  %v108_v39 = vld [vmem:[#allocation2 + $0x88] sm:$0xff] }
  0x2f   :  { %v66_v30 = vadd.f32 %v65_v20, %v59_v13  ;;  %v98_v37 = vadd.f32 %v91_v28, %v90_v27  ;;  %v107_v38 = vld [vmem:[#allocation2 + $0x80] sm:$0xff]  ;;  %v79_v42 = vld [vmem:[#allocation2 + $0x70] sm:$0xff]  ;;  %v87_v43 = vld [vmem:[#allocation5 + $0x68] sm:$0xff]  ;;  %v94_v47 = vmul.f32 %v86_v32, %v77_v31  ;;  %v62_v62 = vmul.f32 %v54_v34, %v46_v33 }
  0x30   :  { %v109_v44 = vld [vmem:[#allocation2 + $0x90] sm:$0xff]  ;;  %v47_v45 = vld [vmem:[#allocation2 + $0x38] sm:$0xff]  ;;  %v116_v49 = vld [vmem:[#allocation5 + $0x80] sm:$0xff]  ;;  %v95_v59 = vmul.f32 %v87_v43, %v78_v35 }
  0x31   :  { %v67_v41 = vadd.f32 %v66_v30, %v60_v19  ;;  %v88_v46 = vld [vmem:[#allocation5 + $0x70] sm:$0xff]  ;;  %v99_v48 = vadd.f32 %v98_v37, %v92_v29  ;;  %v117_v50 = vld [vmem:[#allocation5 + $0x88] sm:$0xff]  ;;  %v110_v51 = vld [vmem:[#allocation2 + $0x98] sm:$0xff]  ;;  %v124_v54 = vmul.f32 %v116_v49, %v107_v38 }
  0x32   :  { %v118_v52 = vld [vmem:[#allocation5 + $0x90] sm:$0xff]  ;;  %v119_v53 = vld [vmem:[#allocation5 + $0x98] sm:$0xff]  ;;  %v125_v55 = vmul.f32 %v117_v50, %v108_v39  ;;  %v111_v0 = vld [vmem:[#allocation2 + $0xa0] sm:$0xff]  ;;  %v96_v3 = vmul.f32 %v88_v46, %v79_v42 }
  0x33   :  { %v55_v56 = vld [vmem:[#allocation5 + $0x38] sm:$0xff]  ;;  %v100_v60 = vadd.f32 %v99_v48, %v93_v36  ;;  %v126_v61 = vmul.f32 %v118_v52, %v109_v44  ;;  %v68_v63 = vadd.f32 %v67_v41, %v61_v40  ;;  %v120_v1 = vld [vmem:[#allocation5 + $0xa0] sm:$0xff]  ;;  %v112_v5 = vld [vmem:[#allocation2 + $0xa8] sm:$0xff]  ;;  %v127_v6 = vmul.f32 %v119_v53, %v110_v51 }
  0x34   :  { %v80_v57 = vld [vmem:[#allocation2 + $0x78] sm:$0xff]  ;;  %v141_v2 = vld [vmem:[#allocation2 + $0xc0] sm:$0xff]  ;;  %v132_v7 = vadd.f32 %v125_v55, %v124_v54  ;;  %v142_v8 = vld [vmem:[#allocation2 + $0xc8] sm:$0xff]  ;;  %v63_v10 = vmul.f32 %v55_v56, %v47_v45  ;;  %v128_v15 = vmul.f32 %v120_v1, %v111_v0 }
  0x35   :  { %v89_v58 = vld [vmem:[#allocation5 + $0x78] sm:$0xff]  ;;  %v101_v4 = vadd.f32 %v100_v60, %v94_v47  ;;  %v143_v9 = vld [vmem:[#allocation2 + $0xd0] sm:$0xff]  ;;  %v121_v11 = vld [vmem:[#allocation5 + $0xa8] sm:$0xff]  ;;  %v69_v21 = vadd.f32 %v68_v63, %v62_v62 }
  0x36   :  { %v144_v12 = vld [vmem:[#allocation2 + $0xd8] sm:$0xff]  ;;  %v150_v13 = vld [vmem:[#allocation5 + $0xc0] sm:$0xff]  ;;  %v133_v16 = vadd.f32 %v132_v7, %v126_v61  ;;  %v151_v17 = vld [vmem:[#allocation5 + $0xc8] sm:$0xff]  ;;  %v97_v22 = vmul.f32 %v89_v58, %v80_v57  ;;  %v129_v28 = vmul.f32 %v121_v11, %v112_v5 }
  0x37   :  { %v102_v14 = vadd.f32 %v101_v4, %v95_v59  ;;  %v152_v18 = vld [vmem:[#allocation5 + $0xd0] sm:$0xff]  ;;  %v153_v19 = vld [vmem:[#allocation5 + $0xd8] sm:$0xff]  ;;  %v158_v20 = vmul.f32 %v150_v13, %v141_v2  ;;  %v159_v25 = vmul.f32 %v151_v17, %v142_v8  ;;  %v145_v30 = vld [vmem:[#allocation2 + $0xe0] sm:$0xff]  ;;  %v70_v40 = vadd.f32 %v69_v21, %v63_v10 }
  0x38   :  { %v113_v23 = vld [vmem:[#allocation2 + $0xb0] sm:$0xff]  ;;  %v160_v26 = vmul.f32 %v152_v18, %v143_v9  ;;  %v134_v29 = vadd.f32 %v133_v16, %v127_v6  ;;  %v154_v31 = vld [vmem:[#allocation5 + $0xe0] sm:$0xff]  ;;  %v114_v32 = vld [vmem:[#allocation2 + $0xb8] sm:$0xff]  ;;  %v161_v34 = vmul.f32 %v153_v19, %v144_v12 }
  0x39   :  { %v122_v24 = vld [vmem:[#allocation5 + $0xb0] sm:$0xff]  ;;  %v103_v27 = vadd.f32 %v102_v14, %v96_v3  ;;  %v123_v33 = vld [vmem:[#allocation5 + $0xb8] sm:$0xff]  ;;  %v166_v35 = vadd.f32 %v159_v25, %v158_v20  ;;  %v146_v38 = vld [vmem:[#allocation2 + $0xe8] sm:$0xff]  ;;  %v162_v42 = vmul.f32 %v154_v31, %v145_v30 }
  0x3a   :  { %v130_v36 = vmul.f32 %v122_v24, %v113_v23  ;;  %v135_v37 = vadd.f32 %v134_v29, %v128_v15  ;;  %v155_v39 = vld [vmem:[#allocation5 + $0xe8] sm:$0xff]  ;;  %v131_v44 = vmul.f32 %v123_v33, %v114_v32  ;;  %v147_v46 = vld [vmem:[#allocation2 + $0xf0] sm:$0xff]  ;;  %v148_v51 = vld [vmem:[#allocation2 + $0xf8] sm:$0xff] }
  0x3b   :  { %v104_v41 = vadd.f32 %v103_v27, %v97_v22  ;;  %v167_v43 = vadd.f32 %v166_v35, %v160_v26  ;;  %v156_v47 = vld [vmem:[#allocation5 + $0xf0] sm:$0xff]  ;;  %v163_v48 = vmul.f32 %v155_v39, %v146_v38  ;;  %v157_v52 = vld [vmem:[#allocation5 + $0xf8] sm:$0xff] }
  0x3c   :  { %v136_v45 = vadd.f32 %v135_v37, %v129_v28  ;;  %v164_v54 = vmul.f32 %v156_v47, %v147_v46  ;;  %v165_v57 = vmul.f32 %v157_v52, %v148_v51 }
  0x3d   :  { %v168_v49 = vadd.f32 %v167_v43, %v161_v34  ;;  %v105_v53 = vadd.f32 %v104_v41, %v70_v40 }
  0x3e   :  { %v137_v50 = vadd.f32 %v136_v45, %v130_v36 }
  0x3f   :  { %v169_v55 = vadd.f32 %v168_v49, %v162_v42 }
  0x40   :  { %v138_v56 = vadd.f32 %v137_v50, %v131_v44 }
  0x41   :  { %v170_v58 = vadd.f32 %v169_v55, %v163_v48 }
  0x42   :  { %v139_v59 = vadd.f32 %v138_v56, %v105_v53 }
  0x43   :  { %v171_v60 = vadd.f32 %v170_v58, %v164_v54 }
  0x45   :  { %v172_v61 = vadd.f32 %v171_v60, %v165_v57 }
  0x47   :  { %v173_v62 = vadd.f32 %v172_v61, %v139_v59 }
  0x49   :  { %175 = vst [vmem:[#allocation7] sm:$0xff] %v173_v62 }
  0x4a   :  { %252 = shalt.err (!%p249_p6)
}
  0x4b   :  { %s253_s10 = scalar_lea.hbm %s327_s2, 128 }
  0x4c   :  { %p254_p7 = scmp.ne.s32.totalorder %s327_s2, %s253_s10  ;;  %p257_p8 = scmp.lt.u32.totalorder %s253_s10, %s327_s2 }
  0x4e   :  { %p259_p9 = pnand %p257_p8, %p254_p7 }
  0x50   :  { %262 = shalt.err (!%p259_p9)
}
  0x51   :  { %185 = dma.vmem_to_hbm [thread:$0]  %s183_s6, 128, %s327_s2, [#allocation4]  }
  0x52   :  { %267 = dma.done.wait [#allocation4], 128  }
  0x53   :  { %268 = vsyncadd [#allocation4], 4294967168 }
  0x54   :  { %189 = vsyncpa [#allocation3], 1 }
  0x55   :  { %190 = vsyncpa [#allocation6], 1 }
  0x56   :  { %191 = vsyncpa [#allocation4], 1 }

</bundles_post_ra>
